<compile_context>
chip_gen: v7x
topology: tpu7x:2x2x1
jax: 0.10.0
libtpu: 0.0.40
codegen_flags: <defaults>
</compile_context>

<pallas_src>
import functools

import jax
import jax.numpy as jnp
import numpy as np
from jax.experimental import pallas as pl
from jax.experimental.pallas import tpu as pltpu


def _round_up(x, m):
    return (x + m - 1) // m * m


# ----------------------------- Pallas kernel --------------------------------
def _mlp_kernel(*refs, num_layers, tanh_action):
    # refs layout: x, (w0, b0), (w1, b1), ..., (w_{L-1}, b_{L-1}), out
    x_ref = refs[0]
    out_ref = refs[-1]
    param_refs = refs[1:-1]

    h = x_ref[...].astype(jnp.float32)
    for layer in range(num_layers):
        w_ref = param_refs[2 * layer]
        b_ref = param_refs[2 * layer + 1]
        h = jnp.dot(h, w_ref[...], preferred_element_type=jnp.float32) + b_ref[...]
        if layer < num_layers - 1:
            h = jnp.maximum(h, 0.0)  # ReLU on hidden layers only (VPU)
    if tanh_action:
        h = jnp.tanh(h)  # EUP slot, free relative to the MXU path
    out_ref[...] = h.astype(out_ref.dtype)


# ----------------------------- Wrapper ---------------------------------------
def det_cont_policy_forward(x, params, *, tanh_action, batch_tile=512):
    """Forward pass of DetContPolicy.

    params: list of (W [in, out], b [1, out]) tuples, applied in order
            (base MLP hidden -> append hidden -> last linear).
    """
    num_layers = len(params)
    batch, in_dim = x.shape
    out_dim = params[-1][0].shape[1]

    LANE = 128
    # ---- lane-dense everywhere: pad every feature dim to a multiple of 128.
    # Zero padding is exact: bias pad = 0, ReLU(0) = 0, padded weight rows
    # contribute 0 to the next matmul, tanh(0) = 0; padded lanes are sliced
    # off at the end.
    dims = [in_dim] + [int(w.shape[1]) for w, _ in params]
    pdims = [_round_up(max(d, LANE), LANE) for d in dims]

    padded_params = []
    for li, (w, b) in enumerate(params):
        rin, cout = pdims[li], pdims[li + 1]
        wp = jnp.pad(
            w.astype(jnp.float32),
            ((0, rin - int(w.shape[0])), (0, cout - int(w.shape[1]))),
        )
        bp = jnp.pad(b.astype(jnp.float32), ((0, 0), (0, cout - int(b.shape[1]))))
        padded_params.append((wp, bp))

    in_pad = pdims[0]
    out_pad = pdims[-1]
    x = x.astype(jnp.float32)
    if in_pad != in_dim:
        x = jnp.pad(x, ((0, 0), (0, in_pad - in_dim)))

    # ---- batch tiling: TM multiple of 8 (f32 sublanes), pad batch to TM ----
    tm = min(batch_tile, _round_up(batch, 8))
    tm = _round_up(tm, 8)
    padded_batch = _round_up(batch, tm)
    if padded_batch != batch:
        x = jnp.pad(x, ((0, padded_batch - batch), (0, 0)))
    grid = (padded_batch // tm,)

    flat = [x]
    for w, b in padded_params:
        flat.append(w)
        flat.append(b)

    kernel = functools.partial(
        _mlp_kernel, num_layers=num_layers, tanh_action=tanh_action
    )

    # Activations tiled over batch; weights/biases resident (constant index map).
    in_specs = [pl.BlockSpec((tm, in_pad), lambda i: (i, 0))]
    for w, b in padded_params:
        in_specs.append(pl.BlockSpec(w.shape, lambda i: (0, 0)))
        in_specs.append(pl.BlockSpec(b.shape, lambda i: (0, 0)))
    out_specs = pl.BlockSpec((tm, out_pad), lambda i: (i, 0))

    # ---- cost estimate (advisory) ----
    flops = 2 * padded_batch * sum(
        int(w.shape[0]) * int(w.shape[1]) for w, _ in padded_params
    )
    param_bytes = sum(int(w.size) + int(b.size) for w, b in padded_params) * 4
    bytes_accessed = param_bytes + padded_batch * (in_pad + out_pad) * 4
    transcendentals = padded_batch * out_pad if tanh_action else 0
    cost = pl.CostEstimate(
        flops=flops, transcendentals=transcendentals, bytes_accessed=bytes_accessed
    )

    # ---- explicit VMEM budget (keeps the design valid on v7x's 64 MiB) ----
    max_width = max(pdims)
    vmem_bytes = 2 * tm * (in_pad + out_pad) * 4          # x/out double buffers
    vmem_bytes += 2 * param_bytes                          # resident params (+slack)
    vmem_bytes += 4 * tm * max_width * 4                   # intermediates headroom
    vmem_limit = int(min(max(2 * vmem_bytes, 4 << 20), 48 << 20))

    out_padded = pl.pallas_call(
        kernel,
        out_shape=jax.ShapeDtypeStruct((padded_batch, out_pad), jnp.float32),
        grid=grid,
        in_specs=in_specs,
        out_specs=out_specs,
        compiler_params=pltpu.CompilerParams(
            dimension_semantics=("parallel",),
            vmem_limit_bytes=vmem_limit,
        ),
        cost_estimate=cost,
    )(*flat)

    return out_padded[:batch, :out_dim]


# ----------------------------- Parameter init -------------------------------
def _fanin_bound(out_features, alpha=0.0):
    # Mirrors _fanin_init on a PyTorch Linear weight of shape (out, in):
    # for 2-D tensors fan_in = size[0] = out_features.
    return float(np.sqrt(1.0 / ((1.0 + alpha * alpha) * out_features)))


def init_det_cont_policy_params(key, input_shape, base_hidden, append_hidden, output_shape):
    """Deterministic init mirroring basic_init / uniform_init from network.py.

    Returns a list of (W [in, out], b [1, out]) for:
      base MLP layers -> append hidden layers -> last layer.
    """
    params = []
    in_dim = input_shape

    # base + append hidden layers: fanin-uniform weight, bias = 0.1
    for out_dim in list(base_hidden) + list(append_hidden):
        key, wk = jax.random.split(key)
        bound = _fanin_bound(out_dim)
        w = jax.random.uniform(
            wk, (in_dim, out_dim), jnp.float32, minval=-bound, maxval=bound
        )
        b = jnp.full((1, out_dim), 0.1, jnp.float32)
        params.append((w, b))
        in_dim = out_dim

    # last layer: uniform(-0.003, 0.003) for weight and bias
    key, wk, bk = jax.random.split(key, 3)
    w_last = jax.random.uniform(
        wk, (in_dim, output_shape), jnp.float32, minval=-0.003, maxval=0.003
    )
    b_last = jax.random.uniform(
        bk, (1, output_shape), jnp.float32, minval=-0.003, maxval=0.003
    )
    params.append((w_last, b_last))
    return params


# ----------------------------- Pure-JAX reference ---------------------------
def _reference_forward(x, params, *, tanh_action):
    h = x.astype(jnp.float32)
    for i, (w, b) in enumerate(params):
        h = h @ w + b
        if i < len(params) - 1:
            h = jnp.maximum(h, 0.0)
    if tanh_action:
        h = jnp.tanh(h)
    return h


# ----------------------------- Main ------------------------------------------
if __name__ == "__main__":
    # Small shapes consistent with the module:
    #   obs_dim=16, base MLP hidden=[32, 32], append_hidden_shapes=[32],
    #   action_dim=4, tanh_action=True, batch=2
    batch, obs_dim, action_dim = 2, 16, 4
    base_hidden = [32, 32]
    append_hidden = [32]
    tanh_action = True

    key = jax.random.PRNGKey(0)
    key, xk = jax.random.split(key)
    x = jax.random.normal(xk, (batch, obs_dim), jnp.float32)

    params = init_det_cont_policy_params(
        key, obs_dim, base_hidden, append_hidden, action_dim
    )

    out = det_cont_policy_forward(x, params, tanh_action=tanh_action)
    out = jax.block_until_ready(out)

    ref = _reference_forward(x, params, tanh_action=tanh_action)
    np.testing.assert_allclose(np.asarray(out), np.asarray(ref), rtol=1e-5, atol=1e-5)

    # Also exercise the multi-tile path (grid > 1) to validate the batch grid.
    key, xk2 = jax.random.split(key)
    big_batch = 2048
    x_big = jax.random.normal(xk2, (big_batch, obs_dim), jnp.float32)
    out_big = det_cont_policy_forward(
        x_big, params, tanh_action=tanh_action, batch_tile=512
    )
    out_big = jax.block_until_ready(out_big)
    ref_big = _reference_forward(x_big, params, tanh_action=tanh_action)
    np.testing.assert_allclose(
        np.asarray(out_big), np.asarray(ref_big), rtol=1e-5, atol=1e-5
    )

    print("KERNEL_OK")
</pallas_src>

<mosaic_0001>
module attributes {stable_mosaic.version = 11 : i64} {
  func.func @_mlp_kernel(%arg0: i32, %arg1: memref<8x128xf32, #tpu.memory_space<vmem>>, %arg2: memref<128x128xf32, #tpu.memory_space<vmem>>, %arg3: memref<1x128xf32, #tpu.memory_space<vmem>>, %arg4: memref<128x128xf32, #tpu.memory_space<vmem>>, %arg5: memref<1x128xf32, #tpu.memory_space<vmem>>, %arg6: memref<128x128xf32, #tpu.memory_space<vmem>>, %arg7: memref<1x128xf32, #tpu.memory_space<vmem>>, %arg8: memref<128x128xf32, #tpu.memory_space<vmem>>, %arg9: memref<1x128xf32, #tpu.memory_space<vmem>>, %arg10: memref<8x128xf32, #tpu.memory_space<vmem>>) attributes {dimension_semantics = [#tpu.dimension_semantics<parallel>], iteration_bounds = array<i64: 1>, scalar_prefetch = 0 : i64, scratch_operands = 0 : i64, tpu.core_type = #tpu.core_type<tc>, window_params = [{transform_indices = @transform_0, window_bounds = array<i64: 8, 128>}, {pipeline_mode = #tpu.pipeline_mode<synchronous>, transform_indices = @transform_1, window_bounds = array<i64: 128, 128>}, {pipeline_mode = #tpu.pipeline_mode<synchronous>, transform_indices = @transform_2, window_bounds = array<i64: 1, 128>}, {pipeline_mode = #tpu.pipeline_mode<synchronous>, transform_indices = @transform_3, window_bounds = array<i64: 128, 128>}, {pipeline_mode = #tpu.pipeline_mode<synchronous>, transform_indices = @transform_4, window_bounds = array<i64: 1, 128>}, {pipeline_mode = #tpu.pipeline_mode<synchronous>, transform_indices = @transform_5, window_bounds = array<i64: 128, 128>}, {pipeline_mode = #tpu.pipeline_mode<synchronous>, transform_indices = @transform_6, window_bounds = array<i64: 1, 128>}, {pipeline_mode = #tpu.pipeline_mode<synchronous>, transform_indices = @transform_7, window_bounds = array<i64: 128, 128>}, {pipeline_mode = #tpu.pipeline_mode<synchronous>, transform_indices = @transform_8, window_bounds = array<i64: 1, 128>}, {transform_indices = @transform_9, window_bounds = array<i64: 8, 128>}]} {
    %c0 = arith.constant 0 : index
    %c0_0 = arith.constant 0 : index
    %0 = vector.load %arg1[%c0, %c0_0] : memref<8x128xf32, #tpu.memory_space<vmem>>, vector<8x128xf32>
    %c0_1 = arith.constant 0 : index
    %c0_2 = arith.constant 0 : index
    %1 = vector.load %arg2[%c0_1, %c0_2] : memref<128x128xf32, #tpu.memory_space<vmem>>, vector<128x128xf32>
    %cst = arith.constant dense<0.000000e+00> : vector<8x128xf32>
    %2 = tpu.matmul %0, %1, %cst {dimension_numbers = #tpu.dot_dimension_numbers<[1], [0], [0], [1], [0, 0, 1, 1], [], []>} : vector<8x128xf32>, vector<128x128xf32>, vector<8x128xf32> -> vector<8x128xf32>
    %c0_3 = arith.constant 0 : index
    %c0_4 = arith.constant 0 : index
    %3 = vector.load %arg3[%c0_3, %c0_4] : memref<1x128xf32, #tpu.memory_space<vmem>>, vector<1x128xf32>
    %4 = vector.broadcast %3 : vector<1x128xf32> to vector<8x128xf32>
    %5 = arith.addf %2, %4 : vector<8x128xf32>
    %cst_5 = arith.constant 0.000000e+00 : f32
    %6 = vector.broadcast %cst_5 : f32 to vector<8x128xf32>
    %7 = arith.maximumf %5, %6 : vector<8x128xf32>
    %c0_6 = arith.constant 0 : index
    %c0_7 = arith.constant 0 : index
    %8 = vector.load %arg4[%c0_6, %c0_7] : memref<128x128xf32, #tpu.memory_space<vmem>>, vector<128x128xf32>
    %cst_8 = arith.constant dense<0.000000e+00> : vector<8x128xf32>
    %9 = tpu.matmul %7, %8, %cst_8 {dimension_numbers = #tpu.dot_dimension_numbers<[1], [0], [0], [1], [0, 0, 1, 1], [], []>} : vector<8x128xf32>, vector<128x128xf32>, vector<8x128xf32> -> vector<8x128xf32>
    %c0_9 = arith.constant 0 : index
    %c0_10 = arith.constant 0 : index
    %10 = vector.load %arg5[%c0_9, %c0_10] : memref<1x128xf32, #tpu.memory_space<vmem>>, vector<1x128xf32>
    %11 = vector.broadcast %10 : vector<1x128xf32> to vector<8x128xf32>
    %12 = arith.addf %9, %11 : vector<8x128xf32>
    %cst_11 = arith.constant 0.000000e+00 : f32
    %13 = vector.broadcast %cst_11 : f32 to vector<8x128xf32>
    %14 = arith.maximumf %12, %13 : vector<8x128xf32>
    %c0_12 = arith.constant 0 : index
    %c0_13 = arith.constant 0 : index
    %15 = vector.load %arg6[%c0_12, %c0_13] : memref<128x128xf32, #tpu.memory_space<vmem>>, vector<128x128xf32>
    %cst_14 = arith.constant dense<0.000000e+00> : vector<8x128xf32>
    %16 = tpu.matmul %14, %15, %cst_14 {dimension_numbers = #tpu.dot_dimension_numbers<[1], [0], [0], [1], [0, 0, 1, 1], [], []>} : vector<8x128xf32>, vector<128x128xf32>, vector<8x128xf32> -> vector<8x128xf32>
    %c0_15 = arith.constant 0 : index
    %c0_16 = arith.constant 0 : index
    %17 = vector.load %arg7[%c0_15, %c0_16] : memref<1x128xf32, #tpu.memory_space<vmem>>, vector<1x128xf32>
    %18 = vector.broadcast %17 : vector<1x128xf32> to vector<8x128xf32>
    %19 = arith.addf %16, %18 : vector<8x128xf32>
    %cst_17 = arith.constant 0.000000e+00 : f32
    %20 = vector.broadcast %cst_17 : f32 to vector<8x128xf32>
    %21 = arith.maximumf %19, %20 : vector<8x128xf32>
    %c0_18 = arith.constant 0 : index
    %c0_19 = arith.constant 0 : index
    %22 = vector.load %arg8[%c0_18, %c0_19] : memref<128x128xf32, #tpu.memory_space<vmem>>, vector<128x128xf32>
    %cst_20 = arith.constant dense<0.000000e+00> : vector<8x128xf32>
    %23 = tpu.matmul %21, %22, %cst_20 {dimension_numbers = #tpu.dot_dimension_numbers<[1], [0], [0], [1], [0, 0, 1, 1], [], []>} : vector<8x128xf32>, vector<128x128xf32>, vector<8x128xf32> -> vector<8x128xf32>
    %c0_21 = arith.constant 0 : index
    %c0_22 = arith.constant 0 : index
    %24 = vector.load %arg9[%c0_21, %c0_22] : memref<1x128xf32, #tpu.memory_space<vmem>>, vector<1x128xf32>
    %25 = vector.broadcast %24 : vector<1x128xf32> to vector<8x128xf32>
    %26 = arith.addf %23, %25 : vector<8x128xf32>
    %27 = math.tanh %26 : vector<8x128xf32>
    %c0_23 = arith.constant 0 : index
    %c0_24 = arith.constant 0 : index
    %28 = vector.load %arg10[%c0_23, %c0_24] : memref<8x128xf32, #tpu.memory_space<vmem>>, vector<8x128xf32>
    tpu.vector_store %arg10[%c0_23, %c0_24], %27 {strides = array<i32>} : memref<8x128xf32, #tpu.memory_space<vmem>>, vector<8x128xf32>,
    return
  }
  func.func @transform_0(%arg0: i32) -> (i32, i32) {
    %c0_i32 = arith.constant 0 : i32
    %c0_i32_0 = arith.constant 0 : i32
    return %arg0, %c0_i32 : i32, i32
  }
  func.func @transform_1(%arg0: i32) -> (i32, i32) {
    %c0_i32 = arith.constant 0 : i32
    %c0_i32_0 = arith.constant 0 : i32
    %c0_i32_1 = arith.constant 0 : i32
    return %c0_i32, %c0_i32_0 : i32, i32
  }
  func.func @transform_2(%arg0: i32) -> (i32, i32) {
    %c0_i32 = arith.constant 0 : i32
    %c0_i32_0 = arith.constant 0 : i32
    %c0_i32_1 = arith.constant 0 : i32
    return %c0_i32, %c0_i32_0 : i32, i32
  }
  func.func @transform_3(%arg0: i32) -> (i32, i32) {
    %c0_i32 = arith.constant 0 : i32
    %c0_i32_0 = arith.constant 0 : i32
    %c0_i32_1 = arith.constant 0 : i32
    return %c0_i32, %c0_i32_0 : i32, i32
  }
  func.func @transform_4(%arg0: i32) -> (i32, i32) {
    %c0_i32 = arith.constant 0 : i32
    %c0_i32_0 = arith.constant 0 : i32
    %c0_i32_1 = arith.constant 0 : i32
    return %c0_i32, %c0_i32_0 : i32, i32
  }
  func.func @transform_5(%arg0: i32) -> (i32, i32) {
    %c0_i32 = arith.constant 0 : i32
    %c0_i32_0 = arith.constant 0 : i32
    %c0_i32_1 = arith.constant 0 : i32
    return %c0_i32, %c0_i32_0 : i32, i32
  }
  func.func @transform_6(%arg0: i32) -> (i32, i32) {
    %c0_i32 = arith.constant 0 : i32
    %c0_i32_0 = arith.constant 0 : i32
    %c0_i32_1 = arith.constant 0 : i32
    return %c0_i32, %c0_i32_0 : i32, i32
  }
  func.func @transform_7(%arg0: i32) -> (i32, i32) {
    %c0_i32 = arith.constant 0 : i32
    %c0_i32_0 = arith.constant 0 : i32
    %c0_i32_1 = arith.constant 0 : i32
    return %c0_i32, %c0_i32_0 : i32, i32
  }
  func.func @transform_8(%arg0: i32) -> (i32, i32) {
    %c0_i32 = arith.constant 0 : i32
    %c0_i32_0 = arith.constant 0 : i32
    %c0_i32_1 = arith.constant 0 : i32
    return %c0_i32, %c0_i32_0 : i32, i32
  }
  func.func @transform_9(%arg0: i32) -> (i32, i32) {
    %c0_i32 = arith.constant 0 : i32
    %c0_i32_0 = arith.constant 0 : i32
    return %arg0, %c0_i32 : i32, i32
  }
}

</mosaic_0001>

<bundles_post_ra>
// kernel: tpu_custom_call.1
= control target key start
LH: loop header
LB: loop body
LE: loop exit
PB: predicated region body
PF: predicated region fallthrough
CT: control target
= control target key end

     0   :  { %14 = vsyncpa [#allocation3], 0  ;;  %s1152_s0 = inlined_call_operand.hbm [shape: f32[8,128], index: 0, kind: input, shape index: {}]   ;;  %s1153_s1 = inlined_call_operand.hbm [shape: f32[128,128], index: 1, kind: input, shape index: {}]   ;;  %s1154_s2 = inlined_call_operand.vmem [shape: f32[1,128], index: 2, kind: input, shape index: {}]   ;;  %s1155_s3 = inlined_call_operand.hbm [shape: f32[128,128], index: 3, kind: input, shape index: {}]   ;;  %s1156_s4 = inlined_call_operand.vmem [shape: f32[1,128], index: 4, kind: input, shape index: {}]   ;;  %s1157_s5 = inlined_call_operand.hbm [shape: f32[128,128], index: 5, kind: input, shape index: {}]   ;;  %s1158_s6 = inlined_call_operand.vmem [shape: f32[1,128], index: 6, kind: input, shape index: {}]   ;;  %s1159_s7 = inlined_call_operand.hbm [shape: f32[128,128], index: 7, kind: input, shape index: {}]   ;;  %s1160_s8 = inlined_call_operand.vmem [shape: f32[1,128], index: 8, kind: input, shape index: {}]   ;;  %s1161_s9 = inlined_call_operand.hbm [shape: f32[8,128], index: 9, kind: output, shape index: {}]  }
   0x1   :  { %15 = vsyncpa [#allocation6], 0 }
   0x2   :  { %16 = vsyncpa [#allocation9], 0 }
   0x3   :  { %17 = vsyncpa [#allocation4], 0  ;;  %s955_s30 = smov [#allocation5]   ;;  %s815_s13 = scalar_lea.hbm %s1153_s1, 2048 }
   0x4   :  { %s33_s10 = sshll.u32 %s955_s30, 4  ;;  %p816_p0 = scmp.ne.s32.totalorder %s1153_s1, %s815_s13  ;;  %s34_s10 = int_to_ptr.vmem [resolvable:$true] %s33_s10 }
   0x5   :  { %p819_p1 = scmp.lt.u32.totalorder %s815_s13, %s1153_s1 }
   0x7   :  { %p821_p2 = pnand %p819_p1, %p816_p0 }
   0x9   :  { %824 = shalt.err (!%p821_p2)
}
   0xa   :  { %s825_s18 = scalar_lea.vmem %s34_s10, 2048  ;;  %p830_p4 = scmp.lt.s32.totalorder %s34_s10, %s34_s10 }
   0xb   :  { %p826_p3 = scmp.ne.s32.totalorder %s34_s10, %s825_s18  ;;  %p831_p5 = scmp.lt.s32.totalorder %s825_s18, %s825_s18 }
   0xd   :  { %p832_p6 = por %p831_p5, %p830_p4 }
   0xf   :  { %p833_p7 = pnand %p832_p6, %p826_p3 }
  0x11   :  { %836 = shalt.err (!%p833_p7)
}
  0x12   :  { %s956_s19 = smov 128   ;;  %s957_s20 = smov 8  }
  0x13   :  { %39 = dma.hbm_to_vmem [thread:$0]  %s1153_s1, 2048, %s34_s10, [#allocation6], %s956_s19, %s956_s19, %s957_s20  }
  0x14   :  { %s958_s23 = smov [#allocation8]   ;;  %s959_s25 = smov [#allocation2]  }
  0x15   :  { %s61_s24 = sshll.u32 %s958_s23, 4  ;;  %s24_s26 = sshll.u32 %s959_s25, 4  ;;  %s62_s24 = int_to_ptr.vmem [resolvable:$true] %s61_s24  ;;  %s25_s26 = int_to_ptr.vmem [resolvable:$true] %s24_s26 }
  0x16   :  { %s837_s29 = scalar_lea.hbm %s1157_s5, 2048 }
  0x17   :  { %p838_p8 = scmp.ne.s32.totalorder %s1157_s5, %s837_s29  ;;  %p841_p9 = scmp.lt.u32.totalorder %s837_s29, %s1157_s5 }
  0x19   :  { %p843_p10 = pnand %p841_p9, %p838_p8 }
  0x1b   :  { %846 = shalt.err (!%p843_p10)
}
  0x1c   :  { %s847_s1 = scalar_lea.vmem %s62_s24, 2048  ;;  %p852_p12 = scmp.lt.s32.totalorder %s62_s24, %s62_s24 }
  0x1d   :  { %p848_p11 = scmp.ne.s32.totalorder %s62_s24, %s847_s1  ;;  %p853_p13 = scmp.lt.s32.totalorder %s847_s1, %s847_s1 }
  0x1f   :  { %p854_p0 = por %p853_p13, %p852_p12 }
  0x21   :  { %p855_p1 = pnand %p854_p0, %p848_p11 }
  0x23   :  { %858 = shalt.err (!%p855_p1)
}
  0x24   :  { %67 = dma.hbm_to_vmem [thread:$0]  %s1157_s5, 2048, %s62_s24, [#allocation9], %s956_s19, %s956_s19, %s957_s20  }
  0x25   :  { %s859_s17 = scalar_lea.hbm %s1152_s0, 128 }
  0x26   :  { %p860_p2 = scmp.ne.s32.totalorder %s1152_s0, %s859_s17  ;;  %p863_p3 = scmp.lt.u32.totalorder %s859_s17, %s1152_s0 }
  0x28   :  { %p865_p4 = pnand %p863_p3, %p860_p2 }
  0x2a   :  { %868 = shalt.err (!%p865_p4)
}
  0x2b   :  { %s869_s25 = scalar_lea.vmem %s25_s26, 128  ;;  %p874_p6 = scmp.lt.s32.totalorder %s25_s26, %s25_s26 }
  0x2c   :  { %p870_p5 = scmp.ne.s32.totalorder %s25_s26, %s869_s25  ;;  %p875_p7 = scmp.lt.s32.totalorder %s869_s25, %s869_s25 }
  0x2e   :  { %p876_p8 = por %p875_p7, %p874_p6 }
  0x30   :  { %p877_p9 = pnand %p876_p8, %p870_p5 }
  0x32   :  { %880 = shalt.err (!%p877_p9)
}
  0x33   :  { %27 = dma.hbm_to_vmem [thread:$0]  %s1152_s0, 128, %s25_s26, [#allocation3]  }
  0x34   :  { %s960_s27 = smov [#allocation7]   ;;  %s961_s29 = smov [#allocation10]  }
  0x35   :  { %s47_s28 = sshll.u32 %s960_s27, 4  ;;  %s75_s30 = sshll.u32 %s961_s29, 4  ;;  %s48_s28 = int_to_ptr.vmem [resolvable:$true] %s47_s28  ;;  %s76_s30 = int_to_ptr.vmem [resolvable:$true] %s75_s30 }
  0x36   :  { %s881_s13 = scalar_lea.hbm %s1155_s3, 2048 }
  0x37   :  { %p882_p10 = scmp.ne.s32.totalorder %s1155_s3, %s881_s13  ;;  %p885_p11 = scmp.lt.u32.totalorder %s881_s13, %s1155_s3 }
  0x39   :  { %p887_p12 = pnand %p885_p11, %p882_p10 }
  0x3b   :  { %890 = shalt.err (!%p887_p12)
}
  0x3c   :  { %s891_s0 = scalar_lea.vmem %s48_s28, 2048  ;;  %p896_p0 = scmp.lt.s32.totalorder %s48_s28, %s48_s28 }
  0x3d   :  { %p892_p13 = scmp.ne.s32.totalorder %s48_s28, %s891_s0  ;;  %p897_p1 = scmp.lt.s32.totalorder %s891_s0, %s891_s0 }
  0x3f   :  { %p898_p2 = por %p897_p1, %p896_p0 }
  0x41   :  { %p899_p3 = pnand %p898_p2, %p892_p13 }
  0x43   :  { %902 = shalt.err (!%p899_p3)
}
  0x44   :  { %53 = dma.hbm_to_vmem [thread:$0]  %s1155_s3, 2048, %s48_s28, [#allocation6], %s956_s19, %s956_s19, %s957_s20  }
  0x45   :  { %s903_s21 = scalar_lea.hbm %s1159_s7, 2048 }
  0x46   :  { %p904_p4 = scmp.ne.s32.totalorder %s1159_s7, %s903_s21  ;;  %p907_p5 = scmp.lt.u32.totalorder %s903_s21, %s1159_s7 }
  0x48   :  { %p909_p6 = pnand %p907_p5, %p904_p4 }
  0x4a   :  { %912 = shalt.err (!%p909_p6)
}
  0x4b   :  { %s913_s24 = scalar_lea.vmem %s76_s30, 2048  ;;  %p918_p8 = scmp.lt.s32.totalorder %s76_s30, %s76_s30 }
  0x4c   :  { %p914_p7 = scmp.ne.s32.totalorder %s76_s30, %s913_s24  ;;  %p919_p9 = scmp.lt.s32.totalorder %s913_s24, %s913_s24 }
  0x4e   :  { %p920_p10 = por %p919_p9, %p918_p8 }
  0x50   :  { %p921_p11 = pnand %p920_p10, %p914_p7 }
  0x52   :  { %924 = shalt.err (!%p921_p11)
}
  0x53   :  { %81 = dma.hbm_to_vmem [thread:$0]  %s1159_s7, 2048, %s76_s30, [#allocation9], %s956_s19, %s956_s19, %s957_s20  }
  0x54   :  { %947 = dma.done.wait [#allocation3], 128  }
  0x55   :  { %948 = vsyncadd [#allocation3], 4294967168 }
  0x56   :  { %949 = dma.done.wait [#allocation6], 4096  }
  0x57   :  { %950 = vsyncadd [#allocation6], 4294963200 }
  0x58   :  { %951 = dma.done.wait [#allocation9], 4096  }
  0x59   :  { %952 = vsyncadd [#allocation9], 4294963200  ;;  %v962_v0 = vmov 0.0|0.0   ;;  %vm963_vm0 = vmmov 0   ;;  %v964_v1 = vmov 0.0   ;;  %v100_v2 = vld [vmem:[#allocation5] sm:$0xff] }
  0x5a   :  { %706 = vmatprep.subr.bf16.mxu0 %v962_v0  ;;  %598 = vmatprep.mubr.msk.f32.mxu0 %vm963_vm0, %v964_v1  ;;  %v101_v3 = vld [vmem:[#allocation5 + $0x8] sm:$0xff]  ;;  %v102_v4 = vld [vmem:[#allocation5 + $0x10] sm:$0xff]  ;;  %v103_v6 = vld [vmem:[#allocation5 + $0x18] sm:$0xff]  ;;  %s965_s11 = smov [#allocation11]  }
  0x5b   :  { %730 = vmatprep.subr.bf16.mxu1 %v962_v0  ;;  %633 = vmatprep.mubr.msk.f32.mxu1 %vm963_vm0, %v964_v1  ;;  %v707_v5 = vpack.c.bf16 %v101_v3, %v100_v2  ;;  %v710_v7 = vpack.c.bf16 %v103_v6, %v102_v4  ;;  %v104_v8 = vld [vmem:[#allocation5 + $0x20] sm:$0xff]  ;;  %v105_v9 = vld [vmem:[#allocation5 + $0x28] sm:$0xff]  ;;  %v196_v12 = vld [vmem:[#allocation7 + $0x10] sm:$0xff]  ;;  %s483_s12 = sshll.u32 %s965_s11, 4  ;;  %s484_s12 = int_to_ptr.vmem [resolvable:$true] %s483_s12 }
  0x5c   :  { %v194_v10 = vld [vmem:[#allocation7] sm:$0xff]  ;;  %v195_v11 = vld [vmem:[#allocation7 + $0x8] sm:$0xff]  ;;  %v197_v13 = vld [vmem:[#allocation7 + $0x18] sm:$0xff]  ;;  %v713_v14 = vpack.c.bf16 %v105_v9, %v104_v8  ;;  %s925_s13 = scalar_lea.vmem %s484_s12, 128  ;;  %p930_p13 = scmp.lt.s32.totalorder %s484_s12, %s484_s12 }
  0x5d   :  { %708 = vmatpush3.bf16.msra.mxu0 %v707_v5  ;;  %v731_v15 = vpack.c.bf16 %v195_v11, %v194_v10  ;;  %v106_v16 = vld [vmem:[#allocation5 + $0x30] sm:$0xff]  ;;  %v107_v17 = vld [vmem:[#allocation5 + $0x38] sm:$0xff]  ;;  %v734_v18 = vpack.c.bf16 %v197_v13, %v196_v12  ;;  %v198_v19 = vld [vmem:[#allocation7 + $0x20] sm:$0xff]  ;;  %p926_p12 = scmp.ne.s32.totalorder %s484_s12, %s925_s13  ;;  %p931_p0 = scmp.lt.s32.totalorder %s925_s13, %s925_s13 }
  0x5e   :  { %709 = vmatprep.subr.bf16.mxu0 %v962_v0  ;;  %v199_v20 = vld [vmem:[#allocation7 + $0x28] sm:$0xff]  ;;  %v716_v21 = vpack.c.bf16 %v107_v17, %v106_v16  ;;  %v108_v22 = vld [vmem:[#allocation5 + $0x40] sm:$0xff]  ;;  %v200_v25 = vld [vmem:[#allocation7 + $0x30] sm:$0xff] }
  0x5f   :  { %732 = vmatpush3.bf16.msra.mxu1 %v731_v15  ;;  %v109_v23 = vld [vmem:[#allocation5 + $0x48] sm:$0xff]  ;;  %v737_v24 = vpack.c.bf16 %v199_v20, %v198_v19  ;;  %v201_v26 = vld [vmem:[#allocation7 + $0x38] sm:$0xff]  ;;  %v110_v28 = vld [vmem:[#allocation5 + $0x50] sm:$0xff]  ;;  %p932_p1 = por %p931_p0, %p930_p13 }
  0x60   :  { %733 = vmatprep.subr.bf16.mxu1 %v962_v0  ;;  %v719_v27 = vpack.c.bf16 %v109_v23, %v108_v22  ;;  %v111_v29 = vld [vmem:[#allocation5 + $0x58] sm:$0xff]  ;;  %v740_v30 = vpack.c.bf16 %v201_v26, %v200_v25  ;;  %v202_v31 = vld [vmem:[#allocation7 + $0x40] sm:$0xff]  ;;  %v203_v32 = vld [vmem:[#allocation7 + $0x48] sm:$0xff] }
  0x61   :  { %711 = vmatpush3.bf16.msra.mxu0 %v710_v7  ;;  %v722_v33 = vpack.c.bf16 %v111_v29, %v110_v28  ;;  %v112_v34 = vld [vmem:[#allocation5 + $0x60] sm:$0xff]  ;;  %v113_v35 = vld [vmem:[#allocation5 + $0x68] sm:$0xff]  ;;  %v743_v36 = vpack.c.bf16 %v203_v32, %v202_v31  ;;  %v204_v37 = vld [vmem:[#allocation7 + $0x50] sm:$0xff]  ;;  %p933_p2 = pnand %p932_p1, %p926_p12 }
  0x62   :  { %712 = vmatprep.subr.bf16.mxu0 %v962_v0  ;;  %v205_v38 = vld [vmem:[#allocation7 + $0x58] sm:$0xff]  ;;  %v725_v39 = vpack.c.bf16 %v113_v35, %v112_v34  ;;  %v114_v40 = vld [vmem:[#allocation5 + $0x70] sm:$0xff]  ;;  %v206_v43 = vld [vmem:[#allocation7 + $0x60] sm:$0xff] }
  0x63   :  { %735 = vmatpush3.bf16.msra.mxu1 %v734_v18  ;;  %v115_v41 = vld [vmem:[#allocation5 + $0x78] sm:$0xff]  ;;  %v746_v42 = vpack.c.bf16 %v205_v38, %v204_v37  ;;  %v207_v44 = vld [vmem:[#allocation7 + $0x68] sm:$0xff]  ;;  %v208_v48 = vld [vmem:[#allocation7 + $0x70] sm:$0xff] }
  0x64   :  { %736 = vmatprep.subr.bf16.mxu1 %v962_v0  ;;  %v728_v45 = vpack.c.bf16 %v115_v41, %v114_v40  ;;  %v749_v46 = vpack.c.bf16 %v207_v44, %v206_v43  ;;  %v99_v47 = vld [vmem:[#allocation2] sm:$0xff]  ;;  %v288_v51 = vld [vmem:[#allocation8] sm:$0xff]  ;;  %v289_v52 = vld [vmem:[#allocation8 + $0x8] sm:$0xff] }
  0x65   :  { %714 = vmatpush3.bf16.msra.mxu0 %v713_v14  ;;  %v209_v49 = vld [vmem:[#allocation7 + $0x78] sm:$0xff]  ;;  %v290_v53 = vld [vmem:[#allocation8 + $0x10] sm:$0xff]  ;;  %v755_v54 = vpack.c.bf16 %v289_v52, %v288_v51  ;;  %v292_v57 = vld [vmem:[#allocation8 + $0x20] sm:$0xff] }
  0x66   :  { %715 = vmatprep.subr.bf16.mxu0 %v962_v0  ;;  %v752_v50 = vpack.c.bf16 %v209_v49, %v208_v48  ;;  %v291_v55 = vld [vmem:[#allocation8 + $0x18] sm:$0xff]  ;;  %v293_v58 = vld [vmem:[#allocation8 + $0x28] sm:$0xff]  ;;  %v294_v60 = vld [vmem:[#allocation8 + $0x30] sm:$0xff] }
  0x67   :  { %738 = vmatpush3.bf16.msra.mxu1 %v737_v24  ;;  %v758_v56 = vpack.c.bf16 %v291_v55, %v290_v53  ;;  %v761_v59 = vpack.c.bf16 %v293_v58, %v292_v57  ;;  %v295_v61 = vld [vmem:[#allocation8 + $0x38] sm:$0xff]  ;;  %v296_v63 = vld [vmem:[#allocation8 + $0x40] sm:$0xff]  ;;  %v297_v2 = vld [vmem:[#allocation8 + $0x48] sm:$0xff] }
  0x68   :  { %739 = vmatprep.subr.bf16.mxu1 %v962_v0  ;;  %v764_v62 = vpack.c.bf16 %v295_v61, %v294_v60  ;;  %v767_v3 = vpack.c.bf16 %v297_v2, %v296_v63  ;;  %v298_v4 = vld [vmem:[#allocation8 + $0x50] sm:$0xff]  ;;  %v299_v5 = vld [vmem:[#allocation8 + $0x58] sm:$0xff]  ;;  %v300_v7 = vld [vmem:[#allocation8 + $0x60] sm:$0xff] }
  0x69   :  { %717 = vmatpush3.bf16.msra.mxu0 %v716_v21  ;;  %v770_v6 = vpack.c.bf16 %v299_v5, %v298_v4  ;;  %v301_v8 = vld [vmem:[#allocation8 + $0x68] sm:$0xff]  ;;  %v494_v10 = vld [vmem:[%s1154_s2] ss:$0 sm:$0xff]  ;;  %v302_v15 = vld [vmem:[#allocation8 + $0x70] sm:$0xff] }
  0x6a   :  { %718 = vmatprep.subr.bf16.mxu0 %v962_v0  ;;  %v773_v9 = vpack.c.bf16 %v301_v8, %v300_v7  ;;  %v303_v16 = vld [vmem:[#allocation8 + $0x78] sm:$0xff]  ;;  %v382_v18 = vld [vmem:[#allocation10] sm:$0xff]  ;;  %v383_v19 = vld [vmem:[#allocation10 + $0x8] sm:$0xff] }
  0x6b   :  { %741 = vmatpush3.bf16.msra.mxu1 %v740_v30  ;;  %v776_v17 = vpack.c.bf16 %v303_v16, %v302_v15  ;;  %v384_v20 = vld [vmem:[#allocation10 + $0x10] sm:$0xff]  ;;  %v779_v21 = vpack.c.bf16 %v383_v19, %v382_v18  ;;  %v385_v22 = vld [vmem:[#allocation10 + $0x18] sm:$0xff]  ;;  %v386_v24 = vld [vmem:[#allocation10 + $0x20] sm:$0xff] }
  0x6c   :  { %742 = vmatprep.subr.bf16.mxu1 %v962_v0  ;;  %v782_v23 = vpack.c.bf16 %v385_v22, %v384_v20  ;;  %v387_v25 = vld [vmem:[#allocation10 + $0x28] sm:$0xff]  ;;  %v390_v29 = vld [vmem:[#allocation10 + $0x40] sm:$0xff]  ;;  %v392_v32 = vld [vmem:[#allocation10 + $0x50] sm:$0xff] }
  0x6d   :  { %720 = vmatpush3.bf16.msra.mxu0 %v719_v27  ;;  %v785_v26 = vpack.c.bf16 %v387_v25, %v386_v24  ;;  %v389_v27 = vld [vmem:[#allocation10 + $0x38] sm:$0xff]  ;;  %v391_v30 = vld [vmem:[#allocation10 + $0x48] sm:$0xff]  ;;  %v394_v35 = vld [vmem:[#allocation10 + $0x60] sm:$0xff] }
  0x6e   :  { %721 = vmatprep.subr.bf16.mxu0 %v962_v0  ;;  %v791_v31 = vpack.c.bf16 %v391_v30, %v390_v29  ;;  %v495_v38 = vld [vmem:[%s1156_s4] ss:$0 sm:$0xff]  ;;  %v396_v43 = vld [vmem:[#allocation10 + $0x70] sm:$0xff] }
  0x6f   :  { %744 = vmatpush3.bf16.msra.mxu1 %v743_v36  ;;  %v395_v36 = vld [vmem:[#allocation10 + $0x68] sm:$0xff]  ;;  %v397_v44 = vld [vmem:[#allocation10 + $0x78] sm:$0xff] }
  0x70   :  { %745 = vmatprep.subr.bf16.mxu1 %v962_v0  ;;  %v797_v37 = vpack.c.bf16 %v395_v36, %v394_v35 }
  0x71   :  { %723 = vmatpush3.bf16.msra.mxu0 %v722_v33  ;;  %v393_v33 = vld [vmem:[#allocation10 + $0x58] sm:$0xff] }
  0x72   :  { %724 = vmatprep.subr.bf16.mxu0 %v962_v0  ;;  %v794_v34 = vpack.c.bf16 %v393_v33, %v392_v32 }
  0x73   :  { %747 = vmatpush3.bf16.msra.mxu1 %v746_v42 }
  0x74   :  { %748 = vmatprep.subr.bf16.mxu1 %v962_v0 }
  0x75   :  { %726 = vmatpush3.bf16.msra.mxu0 %v725_v39 }
  0x76   :  { %727 = vmatprep.subr.bf16.mxu0 %v962_v0 }
  0x77   :  { %750 = vmatpush3.bf16.msra.mxu1 %v749_v46  ;;  %v496_v46 = vld [vmem:[%s1158_s6] ss:$0 sm:$0xff] }
  0x78   :  { %751 = vmatprep.subr.bf16.mxu1 %v962_v0 }
  0x79   :  { %729 = vmatpush3.bf16.msra.mxu0 %v728_v45  ;;  %v800_v45 = vpack.c.bf16 %v397_v44, %v396_v43 }
  0x7a   :  { %754 = vmatprep.subr.bf16.mxu0 %v962_v0 }
  0x7b   :  { %753 = vmatpush3.bf16.msra.mxu1 %v752_v50  ;;  %v497_v50 = vld [vmem:[%s1160_s8] ss:$0 sm:$0xff] }
  0x7c   :  { %599 = vmatmul.mubr.f32.vlgmr.msra.gmra.mrb[0].mxu0 %v99_v47  ;;  %778 = vmatprep.subr.bf16.mxu1 %v962_v0 }
  0x7d   :  { %668 = vmatprep.mubr.msk.f32.mxu0 %vm963_vm0, %v964_v1  ;;  %756 = vmatpush3.bf16.msra.mxu0 %v755_v54 }
  0x7e   :  { %757 = vmatprep.subr.bf16.mxu0 %v962_v0 }
  0x81   :  { %759 = vmatpush3.bf16.msra.mxu0 %v758_v56 }
  0x82   :  { %760 = vmatprep.subr.bf16.mxu0 %v962_v0 }
  0x85   :  { %762 = vmatpush3.bf16.msra.mxu0 %v761_v59 }
  0x86   :  { %763 = vmatprep.subr.bf16.mxu0 %v962_v0 }
  0x89   :  { %765 = vmatpush3.bf16.msra.mxu0 %v764_v62 }
  0x8a   :  { %766 = vmatprep.subr.bf16.mxu0 %v962_v0 }
  0x8d   :  { %768 = vmatpush3.bf16.msra.mxu0 %v767_v3 }
  0x8e   :  { %769 = vmatprep.subr.bf16.mxu0 %v962_v0 }
  0x91   :  { %771 = vmatpush3.bf16.msra.mxu0 %v770_v6 }
  0x92   :  { %772 = vmatprep.subr.bf16.mxu0 %v962_v0 }
  0x95   :  { %774 = vmatpush3.bf16.msra.mxu0 %v773_v9 }
  0x96   :  { %775 = vmatprep.subr.bf16.mxu0 %v962_v0 }
  0x99   :  { %777 = vmatpush3.bf16.msra.mxu0 %v776_v17 }
 0x14f   :  { %v189_v11 = vpop.f32.mrb[0].mxu0 }
 0x150   :  { %v190_v12 = vadd.f32 %v494_v10, %v189_v11  ;;  %v600_v13 = vpop.f32.mrb[1].mxu0 }
 0x152   :  { %v193_v14 = vmax.f32 %v190_v12, 0.0 }
 0x154   :  { %634 = vmatmul.mubr.f32.vlgmr.msra.gmra.mrb[0].mxu1 %v193_v14 }
 0x155   :  { %703 = vmatprep.mubr.msk.f32.mxu1 %vm963_vm0, %v964_v1  ;;  %780 = vmatpush3.bf16.msra.mxu1 %v779_v21  ;;  %v388_v1 = vld [vmem:[#allocation10 + $0x30] sm:$0xff] }
 0x156   :  { %781 = vmatprep.subr.bf16.mxu1 %v962_v0  ;;  %v788_v28 = vpack.c.bf16 %v389_v27, %v388_v1 }
 0x159   :  { %783 = vmatpush3.bf16.msra.mxu1 %v782_v23 }
 0x15a   :  { %784 = vmatprep.subr.bf16.mxu1 %v962_v0 }
 0x15d   :  { %786 = vmatpush3.bf16.msra.mxu1 %v785_v26 }
 0x15e   :  { %787 = vmatprep.subr.bf16.mxu1 %v962_v0 }
 0x161   :  { %789 = vmatpush3.bf16.msra.mxu1 %v788_v28 }
 0x162   :  { %790 = vmatprep.subr.bf16.mxu1 %v962_v0 }
 0x165   :  { %792 = vmatpush3.bf16.msra.mxu1 %v791_v31 }
 0x166   :  { %793 = vmatprep.subr.bf16.mxu1 %v962_v0 }
 0x169   :  { %795 = vmatpush3.bf16.msra.mxu1 %v794_v34 }
 0x16a   :  { %796 = vmatprep.subr.bf16.mxu1 %v962_v0 }
 0x16d   :  { %798 = vmatpush3.bf16.msra.mxu1 %v797_v37 }
 0x16e   :  { %799 = vmatprep.subr.bf16.mxu1 %v962_v0 }
 0x171   :  { %801 = vmatpush3.bf16.msra.mxu1 %v800_v45 }
 0x227   :  { %v283_v39 = vpop.f32.mrb[0].mxu1 }
 0x228   :  { %v284_v40 = vadd.f32 %v495_v38, %v283_v39  ;;  %v635_v41 = vpop.f32.mrb[1].mxu1 }
 0x22a   :  { %v287_v42 = vmax.f32 %v284_v40, 0.0 }
 0x22c   :  { %669 = vmatmul.mubr.f32.vlgmr.msra.gmra.mrb[2].mxu0 %v287_v42 }
 0x2ff   :  { %v377_v47 = vpop.f32.mrb[2].mxu0 }
 0x300   :  { %v378_v48 = vadd.f32 %v496_v46, %v377_v47  ;;  %v670_v0 = vpop.f32.mrb[3].mxu0 }
 0x302   :  { %v381_v49 = vmax.f32 %v378_v48, 0.0 }
 0x304   :  { %704 = vmatmul.mubr.f32.vlgmr.msra.gmra.mrb[2].mxu1 %v381_v49 }
 0x3d7   :  { %v471_v51 = vpop.f32.mrb[2].mxu1 }
 0x3d8   :  { %v472_v52 = vadd.f32 %v497_v50, %v471_v51  ;;  %v705_v53 = vpop.f32.mrb[3].mxu1 }
 0x3da   :  { %813 = vtanh.f32 %v472_v52 }
 0x3e4   :  { %v814_v54 = vpop.eup %813 }
 0x3e5   :  { %476 = vst [vmem:[#allocation11] sm:$0xff] %v814_v54 }
 0x3e6   :  { %936 = shalt.err (!%p933_p2)
}
 0x3e7   :  { %s937_s8 = scalar_lea.hbm %s1161_s9, 128 }
 0x3e8   :  { %p938_p3 = scmp.ne.s32.totalorder %s1161_s9, %s937_s8  ;;  %p941_p4 = scmp.lt.u32.totalorder %s937_s8, %s1161_s9 }
 0x3ea   :  { %p943_p5 = pnand %p941_p4, %p938_p3 }
 0x3ec   :  { %946 = shalt.err (!%p943_p5)
}
 0x3ed   :  { %486 = dma.vmem_to_hbm [thread:$0]  %s484_s12, 128, %s1161_s9, [#allocation4]  }
 0x3ee   :  { %953 = dma.done.wait [#allocation4], 128  }
 0x3ef   :  { %954 = vsyncadd [#allocation4], 4294967168 }
 0x3f0   :  { %490 = vsyncpa [#allocation3], 1 }
 0x3f1   :  { %491 = vsyncpa [#allocation6], 1 }
 0x3f2   :  { %492 = vsyncpa [#allocation9], 1 }
 0x3f3   :  { %493 = vsyncpa [#allocation4], 1 }

</bundles_post_ra>
